<compile_context>
chip_gen: v5e
topology: v5e:2x2
jax: 0.10.0
libtpu: 0.0.40
codegen_flags: <defaults>
</compile_context>

<pallas_src>
from functools import partial

import numpy as np
import jax
import jax.numpy as jnp
from jax import lax
from jax.experimental import pallas as pl
from jax.experimental.pallas import tpu as pltpu


# -----------------------------------------------------------------------------
# Pallas kernel
# -----------------------------------------------------------------------------
def conv_gap_kernel(x_ref, m_ref, w_ref, b_ref, o_ref, *, inv_area):
    """Fused Conv2d(valid, stride 1) + global average pool + flatten.

    x_ref: (N, Cin*H*W)            flattened NCHW input (lane-dense, K on lanes)
    m_ref: (Cin*H*W, Cin*KH*KW)    block-diagonal 0/1 window-membership mask
    w_ref: (Cin*KH*KW, Cout)       conv weight, (cin,kh,kw)-major
    b_ref: (1, Cout)               bias
    o_ref: (N, Cout)               output logits
    """
    # Per-tap window sums: one MXU contraction over the dense Cin*H*W axis.
    s = jnp.dot(x_ref[...], m_ref[...], preferred_element_type=jnp.float32)
    # One small (N, 27) x (27, Cout) matmul instead of 9 K=3 matmuls over a
    # full (N, Ho, Wo, Cout) accumulator.
    logits = jnp.dot(s, w_ref[...], preferred_element_type=jnp.float32)
    o_ref[...] = (logits * inv_area + b_ref[...]).astype(o_ref.dtype)


# -----------------------------------------------------------------------------
# One-time parameter / constant preparation (hoisted out of the forward path)
# -----------------------------------------------------------------------------
def _build_window_mask(cin, h, w, kh, kw):
    """Block-diagonal 0/1 mask M[(cin,h,w), (cin',kh,kw)] = [cin==cin'] *
    [the pixel (h,w) lies inside the (Ho,Wo) window of tap (kh,kw)]."""
    ho, wo = h - kh + 1, w - kw + 1
    base = np.zeros((h, w, kh, kw), np.float32)
    for i in range(kh):
        for j in range(kw):
            base[i:i + ho, j:j + wo, i, j] = 1.0
    mask = np.zeros((cin, h, w, cin, kh, kw), np.float32)
    for c in range(cin):
        mask[c, :, :, c, :, :] = base
    return mask.reshape(cin * h * w, cin * kh * kw)


def prepare_params(w_oihw, bias, H, W):
    """Done once at parameter-load time (not per forward call)."""
    Cout, Cin, KH, KW = w_oihw.shape
    Ho, Wo = H - KH + 1, W - KW + 1
    # OIHW -> (Cin, KH, KW, Cout) -> (Cin*KH*KW, Cout), matching the mask's
    # (cin, kh, kw) flattening order.
    w2 = jnp.transpose(w_oihw, (1, 2, 3, 0)).reshape(Cin * KH * KW, Cout)
    b2 = bias.reshape(1, Cout)
    mask = jnp.asarray(_build_window_mask(Cin, H, W, KH, KW))  # built in numpy, no XLA op
    inv_area = 1.0 / float(Ho * Wo)
    return w2, b2, mask, inv_area


# -----------------------------------------------------------------------------
# Forward wrapper
# -----------------------------------------------------------------------------
def toy_forward(x_nchw, w2, b2, mask, inv_area):
    """x_nchw: (N, Cin, H, W); params from prepare_params()."""
    N, Cin, H, W = x_nchw.shape
    Cout = w2.shape[1]
    # Free reshape of the contiguous NCHW tensor -> (N, Cin*H*W); no transposes.
    x_flat = x_nchw.reshape(N, Cin * H * W)

    # Gridless, whole-in-VMEM: total footprint ~100 KB, far under the scoped
    # VMEM default on v5e/v6e/v7x.
    # TODO(synk): for large N, add a grid over the batch axis with
    # BlockSpec((n_blk, Cin*H*W), ...) and dimension_semantics=("parallel",)
    # sized against v7x's 64 MiB VMEM.
    return pl.pallas_call(
        partial(conv_gap_kernel, inv_area=inv_area),
        out_shape=jax.ShapeDtypeStruct((N, Cout), jnp.float32),
        in_specs=[
            pl.BlockSpec(memory_space=pltpu.MemorySpace.VMEM),
            pl.BlockSpec(memory_space=pltpu.MemorySpace.VMEM),
            pl.BlockSpec(memory_space=pltpu.MemorySpace.VMEM),
            pl.BlockSpec(memory_space=pltpu.MemorySpace.VMEM),
        ],
        out_specs=pl.BlockSpec(memory_space=pltpu.MemorySpace.VMEM),
    )(x_flat, mask, w2, b2)


# -----------------------------------------------------------------------------
# Pure-JAX reference (mirrors the PyTorch module exactly)
# -----------------------------------------------------------------------------
def toy_forward_ref(x_nchw, w_oihw, bias):
    conv = lax.conv_general_dilated(
        x_nchw.astype(jnp.float32), w_oihw.astype(jnp.float32),
        window_strides=(1, 1), padding="VALID",
        dimension_numbers=("NCHW", "OIHW", "NCHW"))
    conv = conv + bias.reshape(1, -1, 1, 1)
    return jnp.mean(conv, axis=(2, 3))  # AdaptiveAvgPool2d((1,1)) + Flatten


if __name__ == "__main__":
    num_classes = 10
    N, Cin, H, W = 2, 3, 16, 16
    KH = KW = 3

    key = jax.random.PRNGKey(0)
    kx, kw_key, kb_key = jax.random.split(key, 3)

    # Deterministic PyTorch-style uniform(-1/sqrt(fan_in), +1/sqrt(fan_in)) init.
    fan_in = Cin * KH * KW
    bound = 1.0 / (fan_in ** 0.5)
    weight = jax.random.uniform(kw_key, (num_classes, Cin, KH, KW),
                                jnp.float32, -bound, bound)
    bias = jax.random.uniform(kb_key, (num_classes,), jnp.float32, -bound, bound)

    x = jax.random.normal(kx, (N, Cin, H, W), jnp.float32)

    # One-time parameter prep (hoisted out of the per-call path).
    w2, b2, mask, inv_area = prepare_params(weight, bias, H, W)

    out = jax.block_until_ready(toy_forward(x, w2, b2, mask, inv_area))
    ref = jax.block_until_ready(toy_forward_ref(x, weight, bias))

    assert out.shape == (N, num_classes), out.shape
    assert jnp.allclose(out, ref, atol=1e-5, rtol=1e-5), (
        f"max abs err {jnp.max(jnp.abs(out - ref))}")
    print("KERNEL_OK")
</pallas_src>

<mosaic_0001>
module attributes {stable_mosaic.version = 11 : i64} {
  func.func @conv_gap_kernel(%arg0: memref<2x768xf32, #tpu.memory_space<vmem>>, %arg1: memref<768x27xf32, #tpu.memory_space<vmem>>, %arg2: memref<27x10xf32, #tpu.memory_space<vmem>>, %arg3: memref<1x10xf32, #tpu.memory_space<vmem>>, %arg4: memref<2x10xf32, #tpu.memory_space<vmem>>) attributes {dimension_semantics = [], scalar_prefetch = 0 : i64, scratch_operands = 0 : i64, tpu.core_type = #tpu.core_type<tc>} {
    %c0 = arith.constant 0 : index
    %c0_0 = arith.constant 0 : index
    %0 = vector.load %arg0[%c0, %c0_0] : memref<2x768xf32, #tpu.memory_space<vmem>>, vector<2x768xf32>
    %c0_1 = arith.constant 0 : index
    %c0_2 = arith.constant 0 : index
    %1 = vector.load %arg1[%c0_1, %c0_2] : memref<768x27xf32, #tpu.memory_space<vmem>>, vector<768x27xf32>
    %cst = arith.constant dense<0.000000e+00> : vector<2x27xf32>
    %2 = tpu.matmul %0, %1, %cst {dimension_numbers = #tpu.dot_dimension_numbers<[1], [0], [0], [1], [0, 0, 1, 1], [], []>} : vector<2x768xf32>, vector<768x27xf32>, vector<2x27xf32> -> vector<2x27xf32>
    %c0_3 = arith.constant 0 : index
    %c0_4 = arith.constant 0 : index
    %3 = vector.load %arg2[%c0_3, %c0_4] : memref<27x10xf32, #tpu.memory_space<vmem>>, vector<27x10xf32>
    %cst_5 = arith.constant dense<0.000000e+00> : vector<2x10xf32>
    %4 = tpu.matmul %2, %3, %cst_5 {dimension_numbers = #tpu.dot_dimension_numbers<[1], [0], [0], [1], [0, 0, 1, 1], [], []>} : vector<2x27xf32>, vector<27x10xf32>, vector<2x10xf32> -> vector<2x10xf32>
    %cst_6 = arith.constant 0.00510204071 : f32
    %5 = vector.broadcast %cst_6 : f32 to vector<2x10xf32>
    %6 = arith.mulf %4, %5 : vector<2x10xf32>
    %c0_7 = arith.constant 0 : index
    %c0_8 = arith.constant 0 : index
    %7 = vector.load %arg3[%c0_7, %c0_8] : memref<1x10xf32, #tpu.memory_space<vmem>>, vector<1x10xf32>
    %8 = vector.broadcast %7 : vector<1x10xf32> to vector<2x10xf32>
    %9 = arith.addf %6, %8 : vector<2x10xf32>
    %c0_9 = arith.constant 0 : index
    %c0_10 = arith.constant 0 : index
    %10 = vector.load %arg4[%c0_9, %c0_10] : memref<2x10xf32, #tpu.memory_space<vmem>>, vector<2x10xf32>
    tpu.vector_store %arg4[%c0_9, %c0_10], %9 {strides = array<i32>} : memref<2x10xf32, #tpu.memory_space<vmem>>, vector<2x10xf32>,
    return
  }
}

</mosaic_0001>

<bundles_post_ra>
// kernel: tpu_custom_call.1
= control target key start
LH: loop header
LB: loop body
LE: loop exit
PB: predicated region body
PF: predicated region fallthrough
CT: control target
= control target key end

     0   :  { %s677_s0 = inlined_call_operand.vmem [shape: f32[2,768], index: 0, kind: input, shape index: {}]   ;;  %s678_s1 = inlined_call_operand.vmem [shape: f32[768,27], index: 1, kind: input, shape index: {}]   ;;  %s679_s2 = inlined_call_operand.vmem [shape: f32[27,10], index: 2, kind: input, shape index: {}]   ;;  %s680_s3 = inlined_call_operand.vmem [shape: f32[1,10], index: 3, kind: input, shape index: {}]   ;;  %s681_s4 = inlined_call_operand.hbm [shape: f32[2,10], index: 4, kind: output, shape index: {}]  }
   0x1   :  { %v35_v0 = vld [vmem:[%s678_s1 + $0x78] sm:$0xff]  ;;  %v34_v1 = vld [vmem:[%s678_s1 + $0x70] sm:$0xff]  ;;  %v33_v4 = vld [vmem:[%s678_s1 + $0x68] sm:$0xff] }
   0x2   :  { %v51_v2 = vld [vmem:[%s678_s1 + $0xf8] sm:$0xff]  ;;  %133 = vmatpush.msra.mxu0 %v35_v0  ;;  %v50_v3 = vld [vmem:[%s678_s1 + $0xf0] sm:$0xff]  ;;  %v49_v5 = vld [vmem:[%s678_s1 + $0xe8] sm:$0xff] }
   0x3   :  { %153 = vmatpush.msra.mxu1 %v51_v2  ;;  %v32_v6 = vld [vmem:[%s678_s1 + $0x60] sm:$0xff]  ;;  %v31_v8 = vld [vmem:[%s678_s1 + $0x58] sm:$0xff]  ;;  %v66_v11 = vld [vmem:[%s678_s1 + $0x170] sm:$0xff] }
   0x4   :  { %134 = vmatpush.msra.mxu0 %v34_v1  ;;  %v48_v7 = vld [vmem:[%s678_s1 + $0xe0] sm:$0xff]  ;;  %v47_v9 = vld [vmem:[%s678_s1 + $0xd8] sm:$0xff]  ;;  %v30_v13 = vld [vmem:[%s678_s1 + $0x50] sm:$0xff] }
   0x5   :  { %154 = vmatpush.msra.mxu1 %v50_v3  ;;  %v67_v10 = vld [vmem:[%s678_s1 + $0x178] sm:$0xff]  ;;  %v46_v14 = vld [vmem:[%s678_s1 + $0xd0] sm:$0xff]  ;;  %v65_v15 = vld [vmem:[%s678_s1 + $0x168] sm:$0xff] }
   0x6   :  { %135 = vmatpush.msra.mxu0 %v33_v4  ;;  %v83_v12 = vld [vmem:[%s678_s1 + $0x1f8] sm:$0xff]  ;;  %173 = vmatpush.msra.mxu2 %v67_v10  ;;  %v82_v16 = vld [vmem:[%s678_s1 + $0x1f0] sm:$0xff]  ;;  %v29_v17 = vld [vmem:[%s678_s1 + $0x48] sm:$0xff] }
   0x7   :  { %155 = vmatpush.msra.mxu1 %v49_v5  ;;  %193 = vmatpush.msra.mxu3 %v83_v12  ;;  %v45_v18 = vld [vmem:[%s678_s1 + $0xc8] sm:$0xff]  ;;  %v64_v20 = vld [vmem:[%s678_s1 + $0x160] sm:$0xff]  ;;  %v63_v24 = vld [vmem:[%s678_s1 + $0x158] sm:$0xff] }
   0x8   :  { %136 = vmatpush.msra.mxu0 %v32_v6  ;;  %174 = vmatpush.msra.mxu2 %v66_v11  ;;  %v81_v19 = vld [vmem:[%s678_s1 + $0x1e8] sm:$0xff]  ;;  %v80_v21 = vld [vmem:[%s678_s1 + $0x1e0] sm:$0xff]  ;;  %v79_v25 = vld [vmem:[%s678_s1 + $0x1d8] sm:$0xff] }
   0x9   :  { %156 = vmatpush.msra.mxu1 %v48_v7  ;;  %194 = vmatpush.msra.mxu3 %v82_v16  ;;  %v28_v22 = vld [vmem:[%s678_s1 + $0x40] sm:$0xff]  ;;  %v27_v26 = vld [vmem:[%s678_s1 + $0x38] sm:$0xff]  ;;  %v62_v28 = vld [vmem:[%s678_s1 + $0x150] sm:$0xff] }
   0xa   :  { %137 = vmatpush.msra.mxu0 %v31_v8  ;;  %v44_v23 = vld [vmem:[%s678_s1 + $0xc0] sm:$0xff]  ;;  %175 = vmatpush.msra.mxu2 %v65_v15  ;;  %v43_v27 = vld [vmem:[%s678_s1 + $0xb8] sm:$0xff]  ;;  %v78_v29 = vld [vmem:[%s678_s1 + $0x1d0] sm:$0xff] }
   0xb   :  { %157 = vmatpush.msra.mxu1 %v47_v9  ;;  %195 = vmatpush.msra.mxu3 %v81_v19  ;;  %v26_v30 = vld [vmem:[%s678_s1 + $0x30] sm:$0xff]  ;;  %v61_v32 = vld [vmem:[%s678_s1 + $0x148] sm:$0xff]  ;;  %v60_v36 = vld [vmem:[%s678_s1 + $0x140] sm:$0xff] }
   0xc   :  { %138 = vmatpush.msra.mxu0 %v30_v13  ;;  %176 = vmatpush.msra.mxu2 %v64_v20  ;;  %v42_v31 = vld [vmem:[%s678_s1 + $0xb0] sm:$0xff]  ;;  %v77_v33 = vld [vmem:[%s678_s1 + $0x1c8] sm:$0xff]  ;;  %v76_v37 = vld [vmem:[%s678_s1 + $0x1c0] sm:$0xff] }
   0xd   :  { %158 = vmatpush.msra.mxu1 %v46_v14  ;;  %196 = vmatpush.msra.mxu3 %v80_v21  ;;  %v25_v34 = vld [vmem:[%s678_s1 + $0x28] sm:$0xff]  ;;  %v24_v38 = vld [vmem:[%s678_s1 + $0x20] sm:$0xff]  ;;  %v59_v40 = vld [vmem:[%s678_s1 + $0x138] sm:$0xff] }
   0xe   :  { %139 = vmatpush.msra.mxu0 %v29_v17  ;;  %177 = vmatpush.msra.mxu2 %v63_v24  ;;  %v41_v35 = vld [vmem:[%s678_s1 + $0xa8] sm:$0xff]  ;;  %v40_v39 = vld [vmem:[%s678_s1 + $0xa0] sm:$0xff]  ;;  %v75_v41 = vld [vmem:[%s678_s1 + $0x1b8] sm:$0xff] }
   0xf   :  { %159 = vmatpush.msra.mxu1 %v45_v18  ;;  %197 = vmatpush.msra.mxu3 %v79_v25  ;;  %v23_v42 = vld [vmem:[%s678_s1 + $0x18] sm:$0xff]  ;;  %v58_v44 = vld [vmem:[%s678_s1 + $0x130] sm:$0xff]  ;;  %v57_v48 = vld [vmem:[%s678_s1 + $0x128] sm:$0xff] }
  0x10   :  { %140 = vmatpush.msra.mxu0 %v28_v22  ;;  %178 = vmatpush.msra.mxu2 %v62_v28  ;;  %v39_v43 = vld [vmem:[%s678_s1 + $0x98] sm:$0xff]  ;;  %v74_v45 = vld [vmem:[%s678_s1 + $0x1b0] sm:$0xff]  ;;  %v73_v49 = vld [vmem:[%s678_s1 + $0x1a8] sm:$0xff] }
  0x11   :  { %160 = vmatpush.msra.mxu1 %v44_v23  ;;  %198 = vmatpush.msra.mxu3 %v78_v29  ;;  %v22_v46 = vld [vmem:[%s678_s1 + $0x10] sm:$0xff]  ;;  %v21_v50 = vld [vmem:[%s678_s1 + $0x8] sm:$0xff]  ;;  %v56_v52 = vld [vmem:[%s678_s1 + $0x120] sm:$0xff] }
  0x12   :  { %141 = vmatpush.msra.mxu0 %v27_v26  ;;  %179 = vmatpush.msra.mxu2 %v61_v32  ;;  %v38_v47 = vld [vmem:[%s678_s1 + $0x90] sm:$0xff]  ;;  %v37_v51 = vld [vmem:[%s678_s1 + $0x88] sm:$0xff]  ;;  %v72_v53 = vld [vmem:[%s678_s1 + $0x1a0] sm:$0xff] }
  0x13   :  { %161 = vmatpush.msra.mxu1 %v43_v27  ;;  %199 = vmatpush.msra.mxu3 %v77_v33  ;;  %v18_v54 = vld [vmem:[%s677_s0] sm:$0xff]  ;;  %v99_v57 = vld [vmem:[%s678_s1 + $0x278] sm:$0xff]  ;;  %v98_v61 = vld [vmem:[%s678_s1 + $0x270] sm:$0xff] }
  0x14   :  { %142 = vmatpush.msra.mxu0 %v26_v30  ;;  %180 = vmatpush.msra.mxu2 %v60_v36  ;;  %v20_v55 = vld [vmem:[%s678_s1] sm:$0xff]  ;;  %118 = vst [vmem:[#allocation1] ss:$4 sm:$0xff] %v18_v54  ;;  %v115_v58 = vld [vmem:[%s678_s1 + $0x2f8] sm:$0xff]  ;;  %v114_v62 = vld [vmem:[%s678_s1 + $0x2f0] sm:$0xff] }
  0x15   :  { %162 = vmatpush.msra.mxu1 %v42_v31  ;;  %200 = vmatpush.msra.mxu3 %v76_v37  ;;  %v36_v56 = vld [vmem:[%s678_s1 + $0x80] sm:$0xff]  ;;  %v55_v59 = vld [vmem:[%s678_s1 + $0x118] sm:$0xff]  ;;  %v54_v63 = vld [vmem:[%s678_s1 + $0x110] sm:$0xff] }
  0x16   :  { %143 = vmatpush.msra.mxu0 %v25_v34  ;;  %181 = vmatpush.msra.mxu2 %v59_v40  ;;  %v71_v60 = vld [vmem:[%s678_s1 + $0x198] sm:$0xff]  ;;  %v70_v0 = vld [vmem:[%s678_s1 + $0x190] sm:$0xff]  ;;  %v19_v1 = vld [vmem:[%s677_s0 + $0x8] sm:$0xf] }
  0x17   :  { %163 = vmatpush.msra.mxu1 %v41_v35  ;;  %201 = vmatpush.msra.mxu3 %v75_v41  ;;  %v97_v2 = vld [vmem:[%s678_s1 + $0x268] sm:$0xff]  ;;  %120 = vst [vmem:[#allocation1 + $0x20] ss:$4 sm:$0xff] %v19_v1 }
  0x18   :  { %144 = vmatpush.msra.mxu0 %v24_v38  ;;  %182 = vmatpush.msra.mxu2 %v58_v44  ;;  %v113_v3 = vld [vmem:[%s678_s1 + $0x2e8] sm:$0xff] }
  0x19   :  { %164 = vmatpush.msra.mxu1 %v40_v39  ;;  %202 = vmatpush.msra.mxu3 %v74_v45 }
  0x1a   :  { %145 = vmatpush.msra.mxu0 %v23_v42  ;;  %183 = vmatpush.msra.mxu2 %v57_v48 }
  0x1b   :  { %165 = vmatpush.msra.mxu1 %v39_v43  ;;  %203 = vmatpush.msra.mxu3 %v73_v49 }
  0x1c   :  { %146 = vmatpush.msra.mxu0 %v22_v46  ;;  %184 = vmatpush.msra.mxu2 %v56_v52 }
  0x1d   :  { %166 = vmatpush.msra.mxu1 %v38_v47  ;;  %204 = vmatpush.msra.mxu3 %v72_v53 }
  0x1e   :  { %147 = vmatpush.msra.mxu0 %v21_v50  ;;  %185 = vmatpush.msra.mxu2 %v55_v59 }
  0x1f   :  { %167 = vmatpush.msra.mxu1 %v37_v51  ;;  %205 = vmatpush.msra.mxu3 %v71_v60 }
  0x20   :  { %148 = vmatpush.msra.mxu0 %v20_v55 }
  0x21   :  { %168 = vmatpush.msra.mxu1 %v36_v56 }
  0x22   :  { %213 = vmatpush.msrb.mxu0 %v99_v57 }
  0x23   :  { %233 = vmatpush.msrb.mxu1 %v115_v58 }
  0x24   :  { %9 = vsyncpa [#allocation3], 0  ;;  %214 = vmatpush.msrb.mxu0 %v98_v61  ;;  %v53_v4 = vld [vmem:[%s678_s1 + $0x108] sm:$0xff]  ;;  %v96_v6 = vld [vmem:[%s678_s1 + $0x260] sm:$0xff]  ;;  %186 = vmatpush.msra.mxu2 %v54_v63  ;;  %vm261_vm0 = vcmask 1042432   ;;  %vm257_vm1 = vcmask 220160  }
  0x25   :  { %234 = vmatpush.msrb.mxu1 %v114_v62  ;;  %v69_v5 = vld [vmem:[%s678_s1 + $0x188] sm:$0xff]  ;;  %v112_v7 = vld [vmem:[%s678_s1 + $0x2e0] sm:$0xff]  ;;  %206 = vmatpush.msra.mxu3 %v70_v0  ;;  %v95_v10 = vld [vmem:[%s678_s1 + $0x258] sm:$0xff]  ;;  %s300_s12 = sshll.u32 %s681_s4, 4  ;;  %vm291_vm2 = vcmask 74752   ;;  %s301_s12 = int_to_ptr.hbm [resolvable:$true] %s300_s12 }
  0x26   :  { %215 = vmatpush.msrb.mxu0 %v97_v2  ;;  %v52_v8 = vld [vmem:[%s678_s1 + $0x100] sm:$0xff]  ;;  %v111_v11 = vld [vmem:[%s678_s1 + $0x2d8] sm:$0xff]  ;;  %187 = vmatpush.msra.mxu2 %v53_v4  ;;  %v123_v12 = vld.sshfl [vmem:[#allocation1 + $0x10] sm:$0xff pattern:$0x73625140] }
  0x27   :  { %235 = vmatpush.msrb.mxu1 %v113_v3  ;;  %v68_v9 = vld [vmem:[%s678_s1 + $0x180] sm:$0xff]  ;;  %207 = vmatpush.msra.mxu3 %v69_v5  ;;  %v124_v13 = vld.sshfl [vmem:[#allocation1 + $0x18] sm:$0xff pattern:$0x73625140]  ;;  %v94_v14 = vld [vmem:[%s678_s1 + $0x250] sm:$0xff] }
  0x28   :  { %216 = vmatpush.msrb.mxu0 %v96_v6  ;;  %v110_v15 = vld [vmem:[%s678_s1 + $0x2d0] sm:$0xff]  ;;  %188 = vmatpush.msra.mxu2 %v52_v8  ;;  %v121_v16 = vld.sshfl [vmem:[#allocation1] sm:$0xff pattern:$0x73625140]  ;;  %v93_v18 = vld [vmem:[%s678_s1 + $0x248] sm:$0xff] }
  0x29   :  { %236 = vmatpush.msrb.mxu1 %v112_v7  ;;  %208 = vmatpush.msra.mxu3 %v68_v9  ;;  %v122_v17 = vld.sshfl [vmem:[#allocation1 + $0x8] sm:$0xff pattern:$0x73625140]  ;;  %v92_v20 = vld [vmem:[%s678_s1 + $0x240] sm:$0xff]  ;;  %v91_v22 = vld [vmem:[%s678_s1 + $0x238] sm:$0xff] }
  0x2a   :  { %217 = vmatpush.msrb.mxu0 %v95_v10  ;;  %v109_v19 = vld [vmem:[%s678_s1 + $0x2c8] sm:$0xff]  ;;  %189 = vmatmul.f32.vlgmr.msra.gmra.mxu2 %v123_v12  ;;  %v108_v21 = vld [vmem:[%s678_s1 + $0x2c0] sm:$0xff]  ;;  %v107_v23 = vld [vmem:[%s678_s1 + $0x2b8] sm:$0xff] }
  0x2b   :  { %237 = vmatpush.msrb.mxu1 %v111_v11  ;;  %209 = vmatmul.f32.vlgmr.msra.gmra.mxu3 %v124_v13  ;;  %v90_v24 = vld [vmem:[%s678_s1 + $0x230] sm:$0xff]  ;;  %v89_v26 = vld [vmem:[%s678_s1 + $0x228] sm:$0xff]  ;;  %v88_v28 = vld [vmem:[%s678_s1 + $0x220] sm:$0xff] }
  0x2c   :  { %218 = vmatpush.msrb.mxu0 %v94_v14  ;;  %169 = vmatmul.f32.vlgmr.msra.gmra.mxu1 %v122_v17  ;;  %v106_v25 = vld [vmem:[%s678_s1 + $0x2b0] sm:$0xff]  ;;  %v105_v27 = vld [vmem:[%s678_s1 + $0x2a8] sm:$0xff]  ;;  %v104_v29 = vld [vmem:[%s678_s1 + $0x2a0] sm:$0xff] }
  0x2d   :  { %238 = vmatpush.msrb.mxu1 %v110_v15  ;;  %149 = vmatmul.f32.vlgmr.msra.gmra.mxu0 %v121_v16  ;;  %v87_v30 = vld [vmem:[%s678_s1 + $0x218] sm:$0xff]  ;;  %v86_v32 = vld [vmem:[%s678_s1 + $0x210] sm:$0xff]  ;;  %v85_v34 = vld [vmem:[%s678_s1 + $0x208] sm:$0xff] }
  0x2e   :  { %219 = vmatpush.msrb.mxu0 %v93_v18  ;;  %v103_v31 = vld [vmem:[%s678_s1 + $0x298] sm:$0xff]  ;;  %v102_v33 = vld [vmem:[%s678_s1 + $0x290] sm:$0xff]  ;;  %v101_v35 = vld [vmem:[%s678_s1 + $0x288] sm:$0xff] }
  0x2f   :  { %239 = vmatpush.msrb.mxu1 %v109_v19  ;;  %v84_v36 = vld [vmem:[%s678_s1 + $0x200] sm:$0xff]  ;;  %v126_v39 = vld.sshfl [vmem:[#allocation1 + $0x28] sm:$0xff pattern:$0x73625140]  ;;  %v256_v40 = vld [vmem:[%s679_s2 + $0x18] sm:$0x7] }
  0x30   :  { %220 = vmatpush.msrb.mxu0 %v92_v20  ;;  %v100_v37 = vld [vmem:[%s678_s1 + $0x280] sm:$0xff]  ;;  %v255_v41 = vld [vmem:[%s679_s2 + $0x10] sm:$0xff]  ;;  %309 = vmatpush.msk.msrb.mxu2 %vm261_vm0, %v256_v40  ;;  %v254_v42 = vld [vmem:[%s679_s2 + $0x8] sm:$0xff] }
  0x31   :  { %240 = vmatpush.msrb.mxu1 %v108_v21  ;;  %v125_v38 = vld.sshfl [vmem:[#allocation1 + $0x20] sm:$0xff pattern:$0x73625140] }
  0x32   :  { %221 = vmatpush.msrb.mxu0 %v91_v22  ;;  %278 = vmatpush.msrb.mxu2 %v255_v41  ;;  %v253_v43 = vld [vmem:[%s679_s2] sm:$0xff]  ;;  %s339_s2 = smov [#allocation2]  }
  0x33   :  { %241 = vmatpush.msrb.mxu1 %v107_v23  ;;  %v312_v55 = vld [vmem:[%s680_s3] ss:$0 sm:$0xff]  ;;  %s298_s9 = sshll.u32 %s339_s2, 4  ;;  %s299_s9 = int_to_ptr.vmem [resolvable:$true] %s298_s9 }
  0x34   :  { %222 = vmatpush.msrb.mxu0 %v90_v24  ;;  %279 = vmatpush.msrb.mxu2 %v254_v42 }
  0x35   :  { %242 = vmatpush.msrb.mxu1 %v106_v25 }
  0x36   :  { %223 = vmatpush.msrb.mxu0 %v89_v26  ;;  %280 = vmatpush.msrb.mxu2 %v253_v43 }
  0x37   :  { %243 = vmatpush.msrb.mxu1 %v105_v27 }
  0x38   :  { %224 = vmatpush.msrb.mxu0 %v88_v28 }
  0x39   :  { %244 = vmatpush.msrb.mxu1 %v104_v29 }
  0x3a   :  { %225 = vmatpush.msrb.mxu0 %v87_v30 }
  0x3b   :  { %245 = vmatpush.msrb.mxu1 %v103_v31 }
  0x3c   :  { %226 = vmatpush.msrb.mxu0 %v86_v32 }
  0x3d   :  { %246 = vmatpush.msrb.mxu1 %v102_v33 }
  0x3e   :  { %227 = vmatpush.msrb.mxu0 %v85_v34 }
  0x3f   :  { %247 = vmatpush.msrb.mxu1 %v101_v35 }
  0x40   :  { %228 = vmatpush.msrb.mxu0 %v84_v36 }
  0x41   :  { %248 = vmatpush.msrb.mxu1 %v100_v37  ;;  %229 = vmatmul.f32.vlgmr.msrb.gmra.mxu0 %v125_v38 }
  0x42   :  { %249 = vmatmul.f32.vlgmr.msrb.gmra.mxu1 %v126_v39 }
  0xa9   :  { %v170_v45 = vpop.f32.mrf.mxu1 }
  0xaa   :  { %v150_v44 = vpop.f32.mrf.mxu0 }
  0xab   :  { %v171_v46 = vadd.f32 %v170_v45, %v150_v44 }
  0xad   :  { %v190_v47 = vpop.f32.mrf.mxu2 }
  0xae   :  { %v191_v48 = vadd.f32 %v190_v47, %v171_v46  ;;  %v210_v49 = vpop.f32.mrf.mxu3 }
  0xb0   :  { %v211_v50 = vadd.f32 %v210_v49, %v191_v48 }
  0xbe   :  { %v230_v51 = vpop.f32.mrf.mxu0 }
  0xbf   :  { %v250_v52 = vpop.f32.mrf.mxu1  ;;  %v231_v53 = vadd.f32 %v230_v51, %v211_v50 }
  0xc1   :  { %v251_v54 = vadd.f32 %v250_v52, %v231_v53 }
  0xc3   :  { %310 = vmatmul.msk.f32.vlgmr.msrb.gmra.mxu2 %vm257_vm1, %v251_v54 }
 0x146   :  { %v282_v56 = vpop.f32.mrf.mxu2 }
 0x147   :  { %v285_v57 = vmul.f32 0.0051020407, %v282_v56 }
 0x149   :  { %v290_v58 = vadd.f32 %v312_v55, %v285_v57 }
 0x14b   :  { %292 = vst.msk [vmem:[#allocation2] sm:$0x3] %vm291_vm2, %v290_v58 }
 0x14c   :  { %303 = dma.vmem_to_hbm [thread:$0]  %s299_s9, 32, %s301_s12, [#allocation3]  }
 0x14d   :  { %337 = dma.done.wait [#allocation3], 32  }
 0x14e   :  { %338 = vsyncadd [#allocation3], 4294967264 }
 0x14f   :  { %308 = vsyncpa [#allocation3], 1 }

</bundles_post_ra>
